<compile_context>
chip_gen: v6e
topology: v6e:2x2x1
jax: 0.10.0
libtpu: 0.0.40
codegen_flags: <defaults>
</compile_context>

<pallas_src>
import functools

import jax
import jax.numpy as jnp
from jax.experimental import pallas as pl
from jax.experimental.pallas import tpu as pltpu

_SUBLANE = 8
_LANE = 128


def _pick_tile_n(n, c, itemsize=4, per_buffer_budget=8 * 1024 * 1024):
    """Largest sublane-aligned row tile whose double-buffered logits stream stays
    within a conservative per-buffer VMEM budget (fits v5e/v6e/v7x scoped VMEM)."""
    c_padded = ((c + _LANE - 1) // _LANE) * _LANE
    max_rows = max(_SUBLANE, per_buffer_budget // (c_padded * itemsize))
    max_rows = min(max_rows, 1024)
    if n <= max_rows:
        return n                                    # one full-extent block is always legal
    return max(_SUBLANE, (max_rows // _SUBLANE) * _SUBLANE)


def _int_pow(x, gamma):
    """x**gamma without float-exponent pow (EUP exp+log) when gamma is an integer."""
    g = float(gamma)
    if g == int(g) and g >= 0:
        ig = int(g)
        if ig == 0:
            return jnp.ones_like(x)
        acc = x
        for _ in range(ig - 1):
            acc = acc * x
        return acc
    return x ** g                                   # x is already clamped >= 0


def _focal_loss_kernel(*refs, gamma, n, tile_n, tiles_per_split, alpha_scalar):
    if alpha_scalar is None:
        logits_ref, targets_ref, alpha_ref, out_ref = refs
    else:
        logits_ref, targets_ref, out_ref = refs
        alpha_ref = None

    s = pl.program_id(0)        # parallel split (megacore sharding on v7x)
    i = pl.program_id(1)        # reduction over row tiles inside this split

    @pl.when(i == 0)
    def _():
        out_ref[...] = jnp.zeros_like(out_ref)

    logits = logits_ref[...].astype(jnp.float32)    # (tile_n, C); bf16 inputs upcast here
    targets = targets_ref[...]                      # (tile_n, 1) int32
    tn, c = logits.shape

    # Numerically stable softmax pieces -- a single exp pass over the tile.
    m = jnp.max(logits, axis=-1, keepdims=True)                     # (tn, 1)
    e = jnp.exp(logits - m)                                         # (tn, C)
    sum_e = jnp.sum(e, axis=-1, keepdims=True)                      # (tn, 1)

    # One-hot "gather" of the target column (no dynamic gather on TPU).
    class_ids = jax.lax.broadcasted_iota(jnp.int32, (tn, c), 1)
    onehot = (class_ids == targets).astype(jnp.float32)             # (tn, C)
    tgt_logit = jnp.sum(logits * onehot, axis=-1, keepdims=True)    # (tn, 1)
    e_tgt = jnp.sum(e * onehot, axis=-1, keepdims=True)             # (tn, 1)

    ce = (m - tgt_logit) + jnp.log(sum_e)           # per-sample cross entropy
    pt = e_tgt / sum_e                              # == exp(-ce), no second exp
    one_minus_pt = jnp.maximum(1.0 - pt, 0.0)       # clamp fp-rounding negatives

    focal = _int_pow(one_minus_pt, gamma) * ce      # (tn, 1)

    if alpha_ref is not None:
        alpha_t = jnp.sum(alpha_ref[...].astype(jnp.float32) * onehot,
                          axis=-1, keepdims=True)
        focal = alpha_t * focal
    elif alpha_scalar != 1.0:
        focal = jnp.float32(alpha_scalar) * focal

    # Mask rows that are padding of the last block or belong to a clamped
    # (duplicated) out-of-range logical tile of this split.
    logical_tile = s * tiles_per_split + i
    rows = logical_tile * tile_n + jax.lax.broadcasted_iota(jnp.int32, (tn, 1), 0)
    focal = jnp.where(rows < n, focal, 0.0)

    # Accumulate into the resident per-split output block (HBM writeback happens
    # only once per split, when the output block index changes).
    out_ref[0] += focal


def focal_loss_pallas(logits, targets, alpha=0.25, gamma=2.0, reduction="mean",
                      tile_n=None, num_splits=None):
    """logits: (N, C) f32/bf16, targets: (N,) int, alpha: None | scalar | (C,) array."""
    n, c = logits.shape
    targets2d = targets.astype(jnp.int32).reshape(n, 1)

    # alpha handling mirrors the PyTorch module constructor.
    if alpha is None:
        alpha_scalar, alpha_vec = 1.0, None
    elif isinstance(alpha, (int, float)):
        alpha_scalar, alpha_vec = float(alpha), None          # uniform-alpha fast path
    else:
        alpha_scalar = None
        alpha_vec = jnp.asarray(alpha, dtype=jnp.float32).reshape(1, c)

    if tile_n is None:
        tile_n = _pick_tile_n(n, c, itemsize=jnp.dtype(logits.dtype).itemsize)
    else:
        tile_n = int(min(max(_SUBLANE, (int(tile_n) // _SUBLANE) * _SUBLANE), n))

    tiles_total = pl.cdiv(n, tile_n)
    if num_splits is None:
        num_splits = min(2, tiles_total)      # 2 TensorCores on v7x; harmless elsewhere
    num_splits = max(1, min(int(num_splits), tiles_total))
    tiles_per_split = pl.cdiv(tiles_total, num_splits)

    def row_block(si, ii):
        # Clamp so duplicated tiles of a ragged split stay in range; their rows are
        # masked out inside the kernel.
        return (jnp.minimum(si * tiles_per_split + ii, tiles_total - 1), 0)

    in_specs = [
        pl.BlockSpec((tile_n, c), row_block),
        pl.BlockSpec((tile_n, 1), row_block),
    ]
    args = [logits, targets2d]
    if alpha_vec is not None:
        in_specs.append(pl.BlockSpec((1, c), lambda si, ii: (0, 0)))  # DMA'd once
        args.append(alpha_vec)

    kernel = functools.partial(
        _focal_loss_kernel, gamma=float(gamma), n=n, tile_n=tile_n,
        tiles_per_split=tiles_per_split, alpha_scalar=alpha_scalar)

    partial_sums = pl.pallas_call(
        kernel,
        out_shape=jax.ShapeDtypeStruct((num_splits, tile_n, 1), jnp.float32),
        grid_spec=pltpu.PrefetchScalarGridSpec(
            num_scalar_prefetch=0,
            grid=(num_splits, tiles_per_split),
            in_specs=in_specs,
            out_specs=pl.BlockSpec((1, tile_n, 1), lambda si, ii: (si, 0, 0)),
        ),
        compiler_params=pltpu.CompilerParams(
            dimension_semantics=("parallel", "arbitrary"),
            vmem_limit_bytes=32 * 1024 * 1024,
        ),
    )(*args)

    total = jnp.sum(partial_sums)
    if reduction == "mean":
        return total / jnp.float32(n)
    elif reduction == "sum":
        return total
    # TODO(synk): reduction='none' (per-sample vector output) is not implemented in
    # the tiled-accumulator kernel; only 'mean'/'sum' are supported here.
    raise NotImplementedError("reduction must be 'mean' or 'sum'")


def focal_loss_ref(logits, targets, alpha_vec, gamma=2.0):
    """Pure-JAX reference matching the torch semantics."""
    lse = jax.scipy.special.logsumexp(logits, axis=-1)
    ce = lse - jnp.take_along_axis(logits, targets[:, None], axis=-1)[:, 0]
    pt = jnp.exp(-ce)
    alpha_t = alpha_vec[targets]
    return jnp.mean(alpha_t * (1.0 - pt) ** gamma * ce)


if __name__ == "__main__":
    num_classes = 6
    gamma = 2.0
    key = jax.random.PRNGKey(0)
    k1, k2, k3, k4 = jax.random.split(key, 4)

    # Case 1: FocalLoss(alpha=0.25, gamma=2.0, num_classes=6), small batch,
    # uniform-alpha fast path, single full-extent block.
    logits1 = jax.random.normal(k1, (8, num_classes), dtype=jnp.float32)
    targets1 = jax.random.randint(k2, (8,), 0, num_classes, dtype=jnp.int32)
    loss1 = jax.block_until_ready(
        focal_loss_pallas(logits1, targets1, alpha=0.25, gamma=gamma))
    ref1 = focal_loss_ref(logits1, targets1,
                          jnp.full((num_classes,), 0.25, jnp.float32), gamma)
    assert jnp.allclose(loss1, ref1, rtol=1e-5, atol=1e-6), (loss1, ref1)

    # Case 2: per-class alpha vector, batch tiled (tile_n=16 -> 3 row tiles, ragged
    # across the 2-way parallel split, padded/duplicated tail rows masked).
    n2 = 40
    logits2 = jax.random.normal(k3, (n2, num_classes), dtype=jnp.float32)
    targets2 = jax.random.randint(k4, (n2,), 0, num_classes, dtype=jnp.int32)
    alpha_vec = jnp.array([0.1, 0.2, 0.3, 0.15, 0.15, 0.1], dtype=jnp.float32)
    loss2 = jax.block_until_ready(
        focal_loss_pallas(logits2, targets2, alpha=alpha_vec, gamma=gamma,
                          tile_n=16, num_splits=2))
    ref2 = focal_loss_ref(logits2, targets2, alpha_vec, gamma)
    assert jnp.allclose(loss2, ref2, rtol=1e-5, atol=1e-6), (loss2, ref2)

    print("KERNEL_OK")
</pallas_src>

<mosaic_0001>
module attributes {stable_mosaic.version = 11 : i64} {
  func.func @_focal_loss_kernel(%arg0: i32, %arg1: i32, %arg2: memref<8x6xf32, #tpu.memory_space<vmem>>, %arg3: memref<8x1xi32, #tpu.memory_space<vmem>>, %arg4: memref<1x8x1xf32, #tpu.memory_space<vmem>>) attributes {dimension_semantics = [#tpu.dimension_semantics<parallel>, #tpu.dimension_semantics<arbitrary>], iteration_bounds = array<i64: 1, 1>, scalar_prefetch = 0 : i64, scratch_operands = 0 : i64, tpu.core_type = #tpu.core_type<tc>, window_params = [{transform_indices = @transform_0, window_bounds = array<i64: 8, 6>}, {transform_indices = @transform_1, window_bounds = array<i64: 8, 1>}, {transform_indices = @transform_2, window_bounds = array<i64: 1, 8, 1>}]} {
    %c0_i32 = arith.constant 0 : i32
    %0 = arith.cmpi eq, %arg1, %c0_i32 : i32
    %1 = arith.extui %0 : i1 to i32
    %c0_i32_0 = arith.constant 0 : i32
    %2 = arith.cmpi ne, %1, %c0_i32_0 : i32
    scf.if %2 {
      %cst_18 = arith.constant 0.000000e+00 : f32
      %51 = vector.broadcast %cst_18 : f32 to vector<1x8x1xf32>
      %c0_19 = arith.constant 0 : index
      %c0_20 = arith.constant 0 : index
      %c0_21 = arith.constant 0 : index
      %52 = vector.load %arg4[%c0_19, %c0_20, %c0_21] : memref<1x8x1xf32, #tpu.memory_space<vmem>>, vector<1x8x1xf32>
      tpu.vector_store %arg4[%c0_19, %c0_20, %c0_21], %51 {strides = array<i32>} : memref<1x8x1xf32, #tpu.memory_space<vmem>>, vector<1x8x1xf32>,
    } else {
    }
    %c0 = arith.constant 0 : index
    %c0_1 = arith.constant 0 : index
    %3 = vector.load %arg2[%c0, %c0_1] : memref<8x6xf32, #tpu.memory_space<vmem>>, vector<8x6xf32>
    %c0_2 = arith.constant 0 : index
    %c0_3 = arith.constant 0 : index
    %4 = vector.load %arg3[%c0_2, %c0_3] : memref<8x1xi32, #tpu.memory_space<vmem>>, vector<8x1xi32>
    %cst = arith.constant dense<0xFF800000> : vector<8xf32>
    %5 = vector.multi_reduction <maximumf>, %3, %cst [1] : vector<8x6xf32> to vector<8xf32>
    %6 = vector.shape_cast %5 : vector<8xf32> to vector<8x1xf32>
    %7 = vector.broadcast %6 : vector<8x1xf32> to vector<8x6xf32>
    %8 = arith.subf %3, %7 : vector<8x6xf32>
    %9 = math.exp %8 : vector<8x6xf32>
    %cst_4 = arith.constant dense<0.000000e+00> : vector<8xf32>
    %10 = vector.multi_reduction <add>, %9, %cst_4 [1] : vector<8x6xf32> to vector<8xf32>
    %11 = vector.shape_cast %10 : vector<8xf32> to vector<8x1xf32>
    %12 = tpu.iota {dimensions = array<i32: 1>} : vector<8x6xi32>
    %13 = vector.broadcast %4 : vector<8x1xi32> to vector<8x6xi32>
    %14 = arith.cmpi eq, %12, %13 : vector<8x6xi32>
    %15 = arith.extui %14 : vector<8x6xi1> to vector<8x6xi32>
    %16 = arith.sitofp %15 : vector<8x6xi32> to vector<8x6xf32>
    %17 = arith.mulf %3, %16 : vector<8x6xf32>
    %cst_5 = arith.constant dense<0.000000e+00> : vector<8xf32>
    %18 = vector.multi_reduction <add>, %17, %cst_5 [1] : vector<8x6xf32> to vector<8xf32>
    %19 = vector.shape_cast %18 : vector<8xf32> to vector<8x1xf32>
    %20 = arith.mulf %9, %16 : vector<8x6xf32>
    %cst_6 = arith.constant dense<0.000000e+00> : vector<8xf32>
    %21 = vector.multi_reduction <add>, %20, %cst_6 [1] : vector<8x6xf32> to vector<8xf32>
    %22 = vector.shape_cast %21 : vector<8xf32> to vector<8x1xf32>
    %23 = arith.subf %6, %19 : vector<8x1xf32>
    %24 = math.log %11 : vector<8x1xf32>
    %25 = arith.addf %23, %24 : vector<8x1xf32>
    %26 = arith.divf %22, %11 : vector<8x1xf32>
    %cst_7 = arith.constant 1.000000e+00 : f32
    %27 = vector.broadcast %cst_7 : f32 to vector<8x1xf32>
    %28 = arith.subf %27, %26 : vector<8x1xf32>
    %cst_8 = arith.constant 0.000000e+00 : f32
    %29 = vector.broadcast %cst_8 : f32 to vector<8x1xf32>
    %30 = arith.maximumf %28, %29 : vector<8x1xf32>
    %31 = arith.mulf %30, %30 : vector<8x1xf32>
    %32 = arith.mulf %31, %25 : vector<8x1xf32>
    %cst_9 = arith.constant 2.500000e-01 : f32
    %33 = vector.broadcast %cst_9 : f32 to vector<8x1xf32>
    %34 = arith.mulf %33, %32 : vector<8x1xf32>
    %c1_i32 = arith.constant 1 : i32
    %35 = arith.muli %arg0, %c1_i32 : i32
    %36 = arith.addi %35, %arg1 : i32
    %c8_i32 = arith.constant 8 : i32
    %37 = arith.muli %36, %c8_i32 : i32
    %38 = tpu.iota {dimensions = array<i32: 0>} : vector<8x1xi32>
    %39 = vector.broadcast %37 : i32 to vector<8x1xi32>
    %40 = arith.addi %39, %38 : vector<8x1xi32>
    %c8_i32_10 = arith.constant 8 : i32
    %41 = vector.broadcast %c8_i32_10 : i32 to vector<8x1xi32>
    %42 = arith.cmpi slt, %40, %41 : vector<8x1xi32>
    %cst_11 = arith.constant 0.000000e+00 : f32
    %43 = vector.broadcast %cst_11 : f32 to vector<8x1xf32>
    %44 = arith.select %42, %34, %43 : vector<8x1xi1>, vector<8x1xf32>
    %c0_12 = arith.constant 0 : index
    %c0_13 = arith.constant 0 : index
    %c0_14 = arith.constant 0 : index
    %45 = vector.load %arg4[%c0_12, %c0_13, %c0_14] : memref<1x8x1xf32, #tpu.memory_space<vmem>>, vector<1x8x1xf32>
    %46 = vector.shape_cast %45 : vector<1x8x1xf32> to vector<8x1xf32>
    %47 = arith.addf %46, %44 : vector<8x1xf32>
    %c0_15 = arith.constant 0 : index
    %c0_16 = arith.constant 0 : index
    %c0_17 = arith.constant 0 : index
    %48 = vector.load %arg4[%c0_15, %c0_16, %c0_17] : memref<1x8x1xf32, #tpu.memory_space<vmem>>, vector<1x8x1xf32>
    %49 = vector.shape_cast %48 : vector<1x8x1xf32> to vector<8x1xf32>
    %50 = vector.shape_cast %47 : vector<8x1xf32> to vector<1x8x1xf32>
    tpu.vector_store %arg4[%c0_15, %c0_16, %c0_17], %50 {strides = array<i32>} : memref<1x8x1xf32, #tpu.memory_space<vmem>>, vector<1x8x1xf32>,
    return
  }
  func.func @transform_0(%arg0: i32, %arg1: i32) -> (i32, i32) {
    %c1_i32 = arith.constant 1 : i32
    %0 = arith.muli %arg0, %c1_i32 : i32
    %1 = arith.addi %0, %arg1 : i32
    %c0_i32 = arith.constant 0 : i32
    %2 = arith.minsi %1, %c0_i32 : i32
    %c0_i32_0 = arith.constant 0 : i32
    %c0_i32_1 = arith.constant 0 : i32
    return %2, %c0_i32_0 : i32, i32
  }
  func.func @transform_1(%arg0: i32, %arg1: i32) -> (i32, i32) {
    %c1_i32 = arith.constant 1 : i32
    %0 = arith.muli %arg0, %c1_i32 : i32
    %1 = arith.addi %0, %arg1 : i32
    %c0_i32 = arith.constant 0 : i32
    %2 = arith.minsi %1, %c0_i32 : i32
    %c0_i32_0 = arith.constant 0 : i32
    %c0_i32_1 = arith.constant 0 : i32
    return %2, %c0_i32_0 : i32, i32
  }
  func.func @transform_2(%arg0: i32, %arg1: i32) -> (i32, i32, i32) {
    %c0_i32 = arith.constant 0 : i32
    %c0_i32_0 = arith.constant 0 : i32
    %c0_i32_1 = arith.constant 0 : i32
    return %arg0, %c0_i32, %c0_i32_0 : i32, i32, i32
  }
}

</mosaic_0001>

<bundles_post_ra>
// kernel: tpu_custom_call.1
= control target key start
LH: loop header
LB: loop body
LE: loop exit
PB: predicated region body
PF: predicated region fallthrough
CT: control target
= control target key end

     0   :  { %vm73_vm0 = vcmask 48128   ;;  %v148_v1 = vmov 0   ;;  %vm69_vm1 = vcmask 7168   ;;  %v149_v3 = vmov 0.0   ;;  %s186_s0 = inlined_call_operand.vmem [shape: f32[8,6], index: 0, kind: input, shape index: {}]   ;;  %s187_s2 = inlined_call_operand.vmem [shape: f32[1,8,1], index: 2, kind: output, shape index: {}]   ;;  %s188_s1 = inlined_call_operand.vmem [shape: s32[8,1], index: 1, kind: input, shape index: {}]  }
   0x1   :  { %v71_v0 = vld [vmem:[%s186_s0] sm:$0xff]  ;;  %141 = vset.pattern.permute.xlu0 %v148_v1  ;;  %70 = vst.msk [vmem:[%s187_s2] sm:$0xff] %vm69_vm1, %v149_v3  ;;  %v83_v8 = vlaneseq }
   0x2   :  { %v74_v2 = vsel %vm73_vm0, %v71_v0, -inf  ;;  %v72_v4 = vld [vmem:[%s188_s1] sm:$0xff] }
   0x3   :  { %75 = vmax.xlane.f32.xlu0 %v74_v2  ;;  %v84_v9 = vand.u32 127, %v83_v8 }
   0x8   :  { %v118_v31 = vld [vmem:[%s187_s2] sm:$0xff] }
  0x19   :  { %86 = vperm.xlu0 %141, %v72_v4  }
  0x8c   :  { %v76_v5 = vpop.xlane.xlu0 %75 }
  0x8d   :  { %v77_v6 = vsub.f32 %v71_v0, %v76_v5 }
  0x8f   :  { %v78_v7 = vmul.f32 1.442695, %v77_v6 }
  0x91   :  { %142 = vpow2.f32 %v78_v7 }
  0x94   :  { %v87_v10 = vpop.permute.xlu0 %86 }
  0x95   :  { %vm88_vm2 = vcmp.eq.s32.totalorder %v84_v9, %v87_v10 }
  0x96   :  { %v138_v11 = vsel %vm88_vm2, 1.0, %v149_v3 }
  0x97   :  { %v91_v15 = vmul.f32 %v138_v11, %v71_v0 }
  0x99   :  { %v92_v17 = vsel %vm73_vm0, %v91_v15, 0.0 }
  0x9e   :  { %v143_v12 = vpop.eup %142 }
  0x9f   :  { %v80_v13 = vsel %vm73_vm0, %v143_v12, 0.0  ;;  %v95_v14 = vmul.f32 %v143_v12, %v138_v11 }
  0xa0   :  { %81 = vadd.xlane.f32.xlu1 %v80_v13 }
  0xa1   :  { %v96_v16 = vsel %vm73_vm0, %v95_v14, 0.0 }
  0xa4   :  { %97 = vadd.xlane.f32.xlu1 %v96_v16 }
  0xa8   :  { %93 = vadd.xlane.f32.xlu1 %v92_v17 }
 0x129   :  { %v82_v18 = vpop.xlane.xlu1 %81 }
 0x12a   :  { %144 = vlog2.f32 %v82_v18 }
 0x12b   :  { %146 = vrcp.f32 %v82_v18 }
 0x12d   :  { %v98_v19 = vpop.xlane.xlu1 %97 }
 0x131   :  { %v94_v23 = vpop.xlane.xlu1 %93 }
 0x132   :  { %v99_v27 = vsub.f32 %v76_v5, %v94_v23 }
 0x137   :  { %v145_v20 = vpop.eup %144 }
 0x138   :  { %v147_v21 = vpop.eup %146  ;;  %v101_v25 = vmul.f32 0.6931472, %v145_v20 }
 0x139   :  { %v104_v22 = vmul.f32 %v147_v21, %v98_v19 }
 0x13a   :  { %v102_v29 = vadd.f32 %v101_v25, %v99_v27 }
 0x13b   :  { %v105_v24 = vsub.f32 1.0, %v104_v22 }
 0x13d   :  { %v106_v26 = vmax.f32 %v105_v24, 0.0 }
 0x13f   :  { %v107_v28 = vmul.f32 %v106_v26, %v106_v26 }
 0x141   :  { %v108_v30 = vmul.f32 %v107_v28, %v102_v29 }
 0x143   :  { %v109_v32 = vmul.f32 0.25, %v108_v30 }
 0x145   :  { %v119_v33 = vadd.f32 %v118_v31, %v109_v32 }
 0x147   :  { %121 = vst.msk [vmem:[%s187_s2] sm:$0xff] %vm69_vm1, %v119_v33 }

</bundles_post_ra>
